<compile_context>
chip_gen: v7x
topology: tpu7x:2x2x1
jax: 0.10.0
libtpu: 0.0.40
codegen_flags: <defaults>
</compile_context>

<pallas_src>
import functools

import numpy as np
import jax
import jax.numpy as jnp
from jax.experimental import pallas as pl
from jax.experimental.pallas import tpu as pltpu


def _round_up(x, m):
    return (x + m - 1) // m * m


# ---------------------------------------------------------------------------
# Tiled linear kernel: y = x @ w + b   (bf16 MXU operands, f32 accumulate)
# ---------------------------------------------------------------------------

def _linear_kernel(x_ref, w_ref, b_ref, o_ref):
    o_ref[...] = (jnp.dot(x_ref[...], w_ref[...],
                          preferred_element_type=jnp.float32)
                  + b_ref[...]).astype(o_ref.dtype)


def linear(x, w, b, *, tile_m=256, tile_n=512):
    """x: (N, Din), w: (Din, Dout), b: (Dout,) or (1, Dout) -> (N, Dout) f32."""
    n, din = x.shape
    dout = w.shape[1]
    n_p = _round_up(n, 8)            # sublane-aligned rows only (no tm padding)
    dout_p = _round_up(dout, 128)    # lane-dense output columns
    tm = min(tile_m, n_p)
    tn = min(tile_n, dout_p)
    x_p = jnp.pad(x, ((0, n_p - n), (0, 0))).astype(jnp.bfloat16)
    w_p = jnp.pad(w, ((0, 0), (0, dout_p - dout))).astype(jnp.bfloat16)
    b_p = jnp.pad(jnp.reshape(b, (1, -1)), ((0, 0), (0, dout_p - dout)))
    out = pl.pallas_call(
        _linear_kernel,
        out_shape=jax.ShapeDtypeStruct((n_p, dout_p), jnp.float32),
        grid=(pl.cdiv(n_p, tm), pl.cdiv(dout_p, tn)),
        in_specs=[pl.BlockSpec((tm, din), lambda i, j: (i, 0)),
                  pl.BlockSpec((din, tn), lambda i, j: (0, j)),
                  pl.BlockSpec((1, tn), lambda i, j: (0, j))],
        out_specs=pl.BlockSpec((tm, tn), lambda i, j: (i, j)),
        compiler_params=pltpu.CompilerParams(
            dimension_semantics=("parallel", "parallel")),
    )(x_p, w_p, b_p)
    return out[:n, :dout]


# ---------------------------------------------------------------------------
# Fused multi-layer LSTM kernel (single pallas_call, weights VMEM-resident)
# ---------------------------------------------------------------------------

def _lstm_stack_kernel(x_ref, wih0_ref, wih_ref, whh_ref, b_ref, out_ref,
                       gx_sc, hseq_sc, *, T, Bp):
    # x_ref:    (T*Bp, E)   bf16  time-major, batch-padded layer-0 inputs
    # wih0_ref: (E, 4*Hp)   bf16  layer-0 input weights (gate-padded cols)
    # wih_ref:  (L, Hp, 4*Hp) bf16 input weights for layers >= 1 (row 0 unused)
    # whh_ref:  (L, Hp, 4*Hp) bf16 recurrent weights, all layers
    # b_ref:    (L, 1, 4*Hp) f32  combined b_ih + b_hh, all layers
    # out_ref:  (T*Bp, Hp)  bf16  final-layer hidden states
    # gx_sc:    (T*Bp, 4*Hp) bf16 hoisted input-projection gates (VMEM)
    # hseq_sc:  (T*Bp, Hp)  bf16  per-layer hidden sequence (VMEM, L>1 only)
    Hp = out_ref.shape[1]
    L = whh_ref.shape[0]
    unroll = T if T <= 16 else 4     # full unroll only for short sequences

    def recurrence(layer, dst_ref):
        # Serial chain: only h @ w_hh per step; i,f,g,o gate order (PyTorch).
        whh_l = whh_ref[layer]       # hoisted: loaded once per layer

        def step(t, carry):
            h, c = carry
            row = pl.multiple_of(t * Bp, Bp)
            gates = (gx_sc[pl.ds(row, Bp), :].astype(jnp.float32)
                     + jnp.dot(h, whh_l, preferred_element_type=jnp.float32))
            i = jax.nn.sigmoid(gates[:, 0:Hp])
            f = jax.nn.sigmoid(gates[:, Hp:2 * Hp])
            g = jnp.tanh(gates[:, 2 * Hp:3 * Hp])
            o = jax.nn.sigmoid(gates[:, 3 * Hp:4 * Hp])
            c = f * c + i * g                                   # f32 cell
            h = (o * jnp.tanh(c)).astype(jnp.bfloat16)          # bf16 hidden
            dst_ref[pl.ds(row, Bp), :] = h
            return (h, c)

        init = (jnp.zeros((Bp, Hp), jnp.bfloat16),
                jnp.zeros((Bp, Hp), jnp.float32))
        jax.lax.fori_loop(0, T, step, init, unroll=unroll)

    # Layer 0: hoisted input projection as one big bf16 MXU matmul.
    gx_sc[...] = (jnp.dot(x_ref[...], wih0_ref[...],
                          preferred_element_type=jnp.float32)
                  + b_ref[0]).astype(jnp.bfloat16)
    recurrence(0, out_ref if L == 1 else hseq_sc)

    # Deeper layers: projection of the whole previous-layer sequence at once.
    # Inter-layer LSTM dropout is train-only; identity here (eval mode).
    for layer in range(1, L):
        gx_sc[...] = (jnp.dot(hseq_sc[...], wih_ref[layer],
                              preferred_element_type=jnp.float32)
                      + b_ref[layer]).astype(jnp.bfloat16)
        recurrence(layer, out_ref if layer == L - 1 else hseq_sc)


def lstm_stack(x, wih0, wih, whh, bias, *, T, Bp, Hp):
    TB, E = x.shape
    L = whh.shape[0]
    hseq_rows = TB if L > 1 else 8   # last layer writes out_ref directly
    kernel = functools.partial(_lstm_stack_kernel, T=T, Bp=Bp)

    def nbytes(a):
        return a.size * a.dtype.itemsize

    needed = (nbytes(x) + nbytes(wih0) + nbytes(wih) + nbytes(whh)
              + nbytes(bias) + TB * Hp * 2          # out (bf16)
              + TB * 4 * Hp * 2                     # gx scratch (bf16)
              + hseq_rows * Hp * 2)                 # hseq scratch (bf16)
    vmem_limit = int(min(max(2 * needed, 32 * 1024 * 1024),
                         128 * 1024 * 1024))

    return pl.pallas_call(
        kernel,
        out_shape=jax.ShapeDtypeStruct((TB, Hp), jnp.bfloat16),
        in_specs=[pl.BlockSpec((TB, E), lambda: (0, 0)),
                  pl.BlockSpec((E, 4 * Hp), lambda: (0, 0)),
                  pl.BlockSpec((L, Hp, 4 * Hp), lambda: (0, 0, 0)),
                  pl.BlockSpec((L, Hp, 4 * Hp), lambda: (0, 0, 0)),
                  pl.BlockSpec((L, 1, 4 * Hp), lambda: (0, 0, 0))],
        out_specs=pl.BlockSpec((TB, Hp), lambda: (0, 0)),
        scratch_shapes=[pltpu.VMEM((TB, 4 * Hp), jnp.bfloat16),
                        pltpu.VMEM((hseq_rows, Hp), jnp.bfloat16)],
        compiler_params=pltpu.CompilerParams(vmem_limit_bytes=vmem_limit),
    )(x, wih0, wih, whh, bias)


# ---------------------------------------------------------------------------
# Parameters (deterministic init, mirroring DecodeLSTM.init_weights)
# ---------------------------------------------------------------------------

def init_params(key, *, vocab_size, embedding_size, hidden_size, num_layers,
                image_feat_size):
    ks = jax.random.split(key, 3 + 4 * num_layers)
    initrange = 0.1
    params = {
        "image_embed_w": jax.random.uniform(
            ks[0], (image_feat_size, embedding_size), jnp.float32,
            -initrange, initrange),
        "image_embed_b": jnp.zeros((1, embedding_size), jnp.float32),
        "word_embed": jax.random.uniform(
            ks[1], (vocab_size, embedding_size), jnp.float32,
            -initrange, initrange),
        "logit_w": jax.random.uniform(
            ks[2], (hidden_size, vocab_size), jnp.float32,
            -initrange, initrange),
        "logit_b": jnp.zeros((1, vocab_size), jnp.float32),
        "lstm": [],
    }
    stdv = 1.0 / np.sqrt(hidden_size)       # PyTorch default LSTM init range
    for layer in range(num_layers):
        in_size = embedding_size if layer == 0 else hidden_size
        k0, k1, k2, k3 = ks[3 + 4 * layer: 7 + 4 * layer]
        w_ih = jax.random.uniform(k0, (in_size, 4 * hidden_size),
                                  jnp.float32, -stdv, stdv)
        w_hh = jax.random.uniform(k1, (hidden_size, 4 * hidden_size),
                                  jnp.float32, -stdv, stdv)
        b_ih = jax.random.uniform(k2, (4 * hidden_size,),
                                  jnp.float32, -stdv, stdv)
        b_hh = jax.random.uniform(k3, (4 * hidden_size,),
                                  jnp.float32, -stdv, stdv)
        params["lstm"].append((w_ih, w_hh, (b_ih + b_hh).reshape(1, -1)))
    return params


# ---------------------------------------------------------------------------
# Forward pass
# ---------------------------------------------------------------------------

def _packed_indices(lengths, batch_size):
    # pack_padded_sequence ordering (enforce_sorted): time-major, keep b while
    # lengths[b] > t.  lengths must be static & sorted descending (API
    # constraint of the PyTorch reference as well).
    t_idx, b_idx = [], []
    for t in range(int(max(lengths))):
        for b in range(batch_size):
            if lengths[b] > t:
                t_idx.append(t)
                b_idx.append(b)
    return np.array(t_idx, np.int32), np.array(b_idx, np.int32)


def _pad_gate_cols(w, H, Hp):
    # (..., 4H) -> (..., 4Hp): each gate's H columns land at the start of its
    # own 128-lane-aligned Hp-wide block (zeros elsewhere).
    parts = []
    for g in range(4):
        blk = w[..., g * H:(g + 1) * H]
        pad = [(0, 0)] * (w.ndim - 1) + [(0, Hp - H)]
        parts.append(jnp.pad(blk, pad))
    return jnp.concatenate(parts, axis=-1)


def decode_lstm_forward(params, images_feats, caption_sentences, lengths):
    B = images_feats.shape[0]
    H = params["lstm"][0][1].shape[0]
    L = len(params["lstm"])

    # image_embed_layer (tiled Pallas matmul)
    image_emb = linear(images_feats, params["image_embed_w"],
                       params["image_embed_b"])                    # (B, E) f32
    # word_embed_layer (gather glue)
    char_emb = params["word_embed"][caption_sentences]             # (B, S, E)
    emb = jnp.concatenate([image_emb[:, None, :], char_emb], axis=1)  # (B,T,E)
    emb_tm = jnp.transpose(emb, (1, 0, 2))                         # (T, B, E)
    T = emb_tm.shape[0]

    # Lane/sublane-dense padding for the fused LSTM kernel (16 for bf16
    # sublane-pair alignment, 128 lanes per gate).
    Bp = _round_up(B, 16)
    Hp = _round_up(H, 128)
    x_p = (jnp.pad(emb_tm, ((0, 0), (0, Bp - B), (0, 0)))
           .reshape(T * Bp, -1).astype(jnp.bfloat16))

    wih0 = _pad_gate_cols(params["lstm"][0][0], H, Hp).astype(jnp.bfloat16)
    wih_list, whh_list, b_list = [], [], []
    for l, (w_ih, w_hh, b) in enumerate(params["lstm"]):
        whh_list.append(jnp.pad(_pad_gate_cols(w_hh, H, Hp),
                                ((0, Hp - H), (0, 0))))
        b_list.append(_pad_gate_cols(b, H, Hp))
        if l == 0:
            wih_list.append(jnp.zeros((Hp, 4 * Hp), jnp.float32))  # unused
        else:
            wih_list.append(jnp.pad(_pad_gate_cols(w_ih, H, Hp),
                                    ((0, Hp - H), (0, 0))))
    wih = jnp.stack(wih_list).astype(jnp.bfloat16)   # (L, Hp, 4Hp)
    whh = jnp.stack(whh_list).astype(jnp.bfloat16)   # (L, Hp, 4Hp)
    bias = jnp.stack(b_list)                         # (L, 1, 4Hp) f32

    # NOTE: timesteps beyond lengths[b] are computed (on pad embeddings) and
    # filtered at the final gather; the gathered packed outputs match PyTorch,
    # but the final (h, c) states (not exposed here) would not.
    h_out = lstm_stack(x_p, wih0, wih, whh, bias, T=T, Bp=Bp, Hp=Hp)  # (T*Bp,Hp)

    t_idx, b_idx = _packed_indices(lengths, B)
    flat_idx = jnp.asarray(t_idx * Bp + b_idx)
    packed_h = h_out[flat_idx][:, :H]                # (N, H) bf16
    # TODO(synk): fuse this packed-row gather into the logits matmul via
    #   PrefetchScalarGridSpec + pl.Element row gather to drop an HBM trip.
    # dropout_layer is identity in eval mode
    return linear(packed_h, params["logit_w"], params["logit_b"])  # (N, V)


# Pure-JAX f32 reference (same math, lax.scan LSTM) for a correctness check.
def reference_forward(params, images_feats, caption_sentences, lengths):
    B = images_feats.shape[0]
    image_emb = images_feats @ params["image_embed_w"] + params["image_embed_b"]
    char_emb = params["word_embed"][caption_sentences]
    emb = jnp.concatenate([image_emb[:, None, :], char_emb], axis=1)
    h_seq = jnp.transpose(emb, (1, 0, 2))
    for (w_ih, w_hh, b) in params["lstm"]:
        H = w_hh.shape[0]

        def step(carry, xt):
            hp, cp = carry
            g = xt @ w_ih + hp @ w_hh + b
            i = jax.nn.sigmoid(g[:, 0:H])
            f = jax.nn.sigmoid(g[:, H:2 * H])
            gg = jnp.tanh(g[:, 2 * H:3 * H])
            o = jax.nn.sigmoid(g[:, 3 * H:4 * H])
            c = f * cp + i * gg
            hh = o * jnp.tanh(c)
            return (hh, c), hh

        init = (jnp.zeros((B, H), jnp.float32), jnp.zeros((B, H), jnp.float32))
        _, h_seq = jax.lax.scan(step, init, h_seq)
    t_idx, b_idx = _packed_indices(lengths, B)
    packed_h = h_seq[jnp.asarray(t_idx), jnp.asarray(b_idx)]
    return packed_h @ params["logit_w"] + params["logit_b"]


# ---------------------------------------------------------------------------

if __name__ == "__main__":
    batch = 2
    image_feat_size = 64
    embedding_size = 32
    hidden_size = 32
    vocab_size = 128
    num_layers = 2
    seq_len = 8                       # caption length; LSTM sees seq_len + 1
    lengths = [9, 7]                  # sorted descending, <= seq_len + 1

    key = jax.random.PRNGKey(0)
    kp, ki, kc = jax.random.split(key, 3)
    params = init_params(kp, vocab_size=vocab_size,
                         embedding_size=embedding_size,
                         hidden_size=hidden_size,
                         num_layers=num_layers,
                         image_feat_size=image_feat_size)

    images_feats = jax.random.normal(ki, (batch, image_feat_size), jnp.float32)
    caption_sentences = jax.random.randint(kc, (batch, seq_len), 0, vocab_size,
                                           dtype=jnp.int32)

    out = decode_lstm_forward(params, images_feats, caption_sentences, lengths)
    out = jax.block_until_ready(out)

    ref = jax.block_until_ready(
        reference_forward(params, images_feats, caption_sentences, lengths))

    assert out.shape == (sum(lengths), vocab_size), out.shape
    # bf16 MXU operands vs f32 reference -> loosened tolerance.
    np.testing.assert_allclose(np.asarray(out), np.asarray(ref),
                               atol=3e-2, rtol=3e-2)
    print("KERNEL_OK")
</pallas_src>

<mosaic_0001>
module attributes {stable_mosaic.version = 11 : i64} {
  func.func @_linear_kernel(%arg0: i32, %arg1: i32, %arg2: memref<8x64xbf16, #tpu.memory_space<vmem>>, %arg3: memref<64x128xbf16, #tpu.memory_space<vmem>>, %arg4: memref<1x128xf32, #tpu.memory_space<vmem>>, %arg5: memref<8x128xf32, #tpu.memory_space<vmem>>) attributes {dimension_semantics = [#tpu.dimension_semantics<parallel>, #tpu.dimension_semantics<parallel>], iteration_bounds = array<i64: 1, 1>, scalar_prefetch = 0 : i64, scratch_operands = 0 : i64, tpu.core_type = #tpu.core_type<tc>, window_params = [{transform_indices = @transform_0, window_bounds = array<i64: 8, 64>}, {transform_indices = @transform_1, window_bounds = array<i64: 64, 128>}, {transform_indices = @transform_2, window_bounds = array<i64: 1, 128>}, {transform_indices = @transform_3, window_bounds = array<i64: 8, 128>}]} {
    %c0 = arith.constant 0 : index
    %c0_0 = arith.constant 0 : index
    %0 = vector.load %arg2[%c0, %c0_0] : memref<8x64xbf16, #tpu.memory_space<vmem>>, vector<8x64xbf16>
    %c0_1 = arith.constant 0 : index
    %c0_2 = arith.constant 0 : index
    %1 = vector.load %arg3[%c0_1, %c0_2] : memref<64x128xbf16, #tpu.memory_space<vmem>>, vector<64x128xbf16>
    %cst = arith.constant dense<0.000000e+00> : vector<8x128xf32>
    %2 = tpu.matmul %0, %1, %cst {dimension_numbers = #tpu.dot_dimension_numbers<[1], [0], [0], [1], [0, 0, 1, 1], [], []>} : vector<8x64xbf16>, vector<64x128xbf16>, vector<8x128xf32> -> vector<8x128xf32>
    %c0_3 = arith.constant 0 : index
    %c0_4 = arith.constant 0 : index
    %3 = vector.load %arg4[%c0_3, %c0_4] : memref<1x128xf32, #tpu.memory_space<vmem>>, vector<1x128xf32>
    %4 = vector.broadcast %3 : vector<1x128xf32> to vector<8x128xf32>
    %5 = arith.addf %2, %4 : vector<8x128xf32>
    %c0_5 = arith.constant 0 : index
    %c0_6 = arith.constant 0 : index
    %6 = vector.load %arg5[%c0_5, %c0_6] : memref<8x128xf32, #tpu.memory_space<vmem>>, vector<8x128xf32>
    tpu.vector_store %arg5[%c0_5, %c0_6], %5 {strides = array<i32>} : memref<8x128xf32, #tpu.memory_space<vmem>>, vector<8x128xf32>,
    return
  }
  func.func @transform_0(%arg0: i32, %arg1: i32) -> (i32, i32) {
    %c0_i32 = arith.constant 0 : i32
    %c0_i32_0 = arith.constant 0 : i32
    return %arg0, %c0_i32 : i32, i32
  }
  func.func @transform_1(%arg0: i32, %arg1: i32) -> (i32, i32) {
    %c0_i32 = arith.constant 0 : i32
    %c0_i32_0 = arith.constant 0 : i32
    return %c0_i32, %arg1 : i32, i32
  }
  func.func @transform_2(%arg0: i32, %arg1: i32) -> (i32, i32) {
    %c0_i32 = arith.constant 0 : i32
    %c0_i32_0 = arith.constant 0 : i32
    return %c0_i32, %arg1 : i32, i32
  }
  func.func @transform_3(%arg0: i32, %arg1: i32) -> (i32, i32) {
    %c0_i32 = arith.constant 0 : i32
    return %arg0, %arg1 : i32, i32
  }
}

</mosaic_0001>

<bundles_post_ra>
// kernel: tpu_custom_call.1
= control target key start
LH: loop header
LB: loop body
LE: loop exit
PB: predicated region body
PF: predicated region fallthrough
CT: control target
= control target key end

     0   :  { %8 = vsyncpa [#allocation3], 0  ;;  %s322_s0 = inlined_call_operand.hbm [shape: bf16[8,64], index: 0, kind: input, shape index: {}]   ;;  %s323_s1 = inlined_call_operand.hbm [shape: bf16[64,128], index: 1, kind: input, shape index: {}]   ;;  %s324_s2 = inlined_call_operand.vmem [shape: f32[1,128], index: 2, kind: input, shape index: {}]   ;;  %s325_s3 = inlined_call_operand.hbm [shape: f32[8,128], index: 3, kind: output, shape index: {}]  }
   0x1   :  { %9 = vsyncpa [#allocation6], 0 }
   0x2   :  { %10 = vsyncpa [#allocation4], 0  ;;  %s249_s12 = smov [#allocation2]   ;;  %s250_s14 = smov [#allocation5]  }
   0x3   :  { %s17_s13 = sshll.u32 %s249_s12, 4  ;;  %s26_s15 = sshll.u32 %s250_s14, 4  ;;  %s18_s13 = int_to_ptr.vmem [resolvable:$true] %s17_s13  ;;  %s276_s15 = int_to_ptr.vmem [resolvable:$true] %s26_s15 }
   0x4   :  { %s177_s18 = scalar_lea.hbm %s322_s0, 64 }
   0x5   :  { %p178_p0 = scmp.ne.s32.totalorder %s322_s0, %s177_s18  ;;  %p181_p1 = scmp.lt.u32.totalorder %s177_s18, %s322_s0 }
   0x7   :  { %p183_p2 = pnand %p181_p1, %p178_p0 }
   0x9   :  { %186 = shalt.err (!%p183_p2)
}
   0xa   :  { %s187_s23 = scalar_lea.vmem %s18_s13, 64  ;;  %p192_p4 = scmp.lt.s32.totalorder %s18_s13, %s18_s13 }
   0xb   :  { %p188_p3 = scmp.ne.s32.totalorder %s18_s13, %s187_s23  ;;  %p193_p5 = scmp.lt.s32.totalorder %s187_s23, %s187_s23 }
   0xd   :  { %p194_p6 = por %p193_p5, %p192_p4 }
   0xf   :  { %p195_p7 = pnand %p194_p6, %p188_p3 }
  0x11   :  { %198 = shalt.err (!%p195_p7)
}
  0x12   :  { %20 = dma.hbm_to_vmem [thread:$0]  %s322_s0, 64, %s18_s13, [#allocation3]  }
  0x13   :  { %s199_s28 = scalar_lea.hbm %s323_s1, 512 }
  0x14   :  { %p200_p8 = scmp.ne.s32.totalorder %s323_s1, %s199_s28  ;;  %p203_p9 = scmp.lt.u32.totalorder %s199_s28, %s323_s1 }
  0x16   :  { %p205_p10 = pnand %p203_p9, %p200_p8 }
  0x18   :  { %208 = shalt.err (!%p205_p10)
}
  0x19   :  { %s209_s6 = scalar_lea.vmem %s276_s15, 512  ;;  %p214_p12 = scmp.lt.s32.totalorder %s276_s15, %s276_s15 }
  0x1a   :  { %p210_p11 = scmp.ne.s32.totalorder %s276_s15, %s209_s6  ;;  %p215_p13 = scmp.lt.s32.totalorder %s209_s6, %s209_s6 }
  0x1c   :  { %p216_p0 = por %p215_p13, %p214_p12 }
  0x1e   :  { %p217_p1 = pnand %p216_p0, %p210_p11 }
  0x20   :  { %220 = shalt.err (!%p217_p1)
}
  0x21   :  { %s251_s0 = smov 64   ;;  %s252_s7 = smov 4  }
  0x22   :  { %32 = dma.hbm_to_vmem [thread:$0]  %s323_s1, 512, %s276_s15, [#allocation6], %s251_s0, %s251_s0, %s252_s7  }
  0x23   :  { %243 = dma.done.wait [#allocation3], 64  }
  0x24   :  { %244 = vsyncadd [#allocation3], 4294967232 }
  0x25   :  { %245 = dma.done.wait [#allocation6], 512  }
  0x26   :  { %246 = vsyncadd [#allocation6], 4294966784  ;;  %v253_v0 = vmov 0.0   ;;  %vm254_vm0 = vmmov 0   ;;  %v173_v1 = vld [vmem:[#allocation5] sm:$0xff]   ;;  %v174_v2 = vld [vmem:[#allocation5 + $0x8] sm:$0xff]  }
  0x27   :  { %154 = vmatprep.subr.bf16.mxu0 %v253_v0  ;;  %162 = vmatprep.mubr.msk.bf16.mxu0 %vm254_vm0, %v253_v0  ;;  %v175_v3 = vld [vmem:[#allocation5 + $0x10] sm:$0xff]   ;;  %v176_v4 = vld [vmem:[#allocation5 + $0x18] sm:$0xff]   ;;  %vm82_vm1 = vcmask 523264   ;;  %s255_s11 = smov [#allocation7]  }
  0x28   :  { %155 = vmatpush3.bf16.msra.mxu0 %v173_v1  ;;  %v42_v5 = vld [vmem:[#allocation2] sm:$0xf]  ;;  %s133_s12 = sshll.u32 %s255_s11, 4  ;;  %s134_s12 = int_to_ptr.vmem [resolvable:$true] %s133_s12 }
  0x29   :  { %156 = vmatprep.subr.bf16.mxu0 %v253_v0  ;;  %v143_v6 = vld [vmem:[%s324_s2] ss:$0 sm:$0xff]  ;;  %s221_s13 = scalar_lea.vmem %s134_s12, 128  ;;  %p226_p3 = scmp.lt.s32.totalorder %s134_s12, %s134_s12 }
  0x2a   :  { %p222_p2 = scmp.ne.s32.totalorder %s134_s12, %s221_s13  ;;  %p227_p4 = scmp.lt.s32.totalorder %s221_s13, %s221_s13 }
  0x2c   :  { %157 = vmatpush3.bf16.msra.mxu0 %v174_v2  ;;  %p228_p5 = por %p227_p4, %p226_p3 }
  0x2d   :  { %158 = vmatprep.subr.bf16.mxu0 %v253_v0 }
  0x2e   :  { %p229_p6 = pnand %p228_p5, %p222_p2 }
  0x30   :  { %159 = vmatpush3.bf16.msra.mxu0 %v175_v3 }
  0x31   :  { %160 = vmatprep.subr.bf16.mxu0 %v253_v0 }
  0x34   :  { %161 = vmatpush3.bf16.msra.mxu0 %v176_v4 }
  0x37   :  { %163 = vmatmul.mubr.msk.bf16.vlgmr.msra.gmra.mrb[0].mxu0 %vm82_vm1, %v42_v5 }
 0x10a   :  { %v120_v7 = vpop.f32.mrb[0].mxu0 }
 0x10b   :  { %v121_v8 = vadd.f32 %v143_v6, %v120_v7  ;;  %v164_v9 = vpop.f32.mrb[1].mxu0 }
 0x10c   :  { %v123_v10 = vpop.f32.mrb[2].mxu0 }
 0x10d   :  { %126 = vst [vmem:[#allocation7] sm:$0xff] %v121_v8  ;;  %v165_v11 = vpop.f32.mrb[3].mxu0 }
 0x10e   :  { %232 = shalt.err (!%p229_p6)
}
 0x10f   :  { %s233_s2 = scalar_lea.hbm %s325_s3, 128 }
 0x110   :  { %p234_p7 = scmp.ne.s32.totalorder %s325_s3, %s233_s2  ;;  %p237_p8 = scmp.lt.u32.totalorder %s233_s2, %s325_s3 }
 0x112   :  { %p239_p9 = pnand %p237_p8, %p234_p7 }
 0x114   :  { %242 = shalt.err (!%p239_p9)
}
 0x115   :  { %136 = dma.vmem_to_hbm [thread:$0]  %s134_s12, 128, %s325_s3, [#allocation4]  }
 0x116   :  { %247 = dma.done.wait [#allocation4], 128  }
 0x117   :  { %248 = vsyncadd [#allocation4], 4294967168 }
 0x118   :  { %140 = vsyncpa [#allocation3], 1 }
 0x119   :  { %141 = vsyncpa [#allocation6], 1 }
 0x11a   :  { %142 = vsyncpa [#allocation4], 1 }

</bundles_post_ra>
